<compile_context>
chip_gen: v7x
topology: tpu7x:2x2x1
jax: 0.10.0
libtpu: 0.0.40
codegen_flags: <defaults>
</compile_context>

<pallas_src>
import jax
import jax.numpy as jnp
from jax.experimental import pallas as pl
from jax.experimental.pallas import tpu as pltpu

BN_EPS = 1e-5


def _round_up(x, m):
    return ((x + m - 1) // m) * m


def causal_mlp_kernel(x_ref, w1_ref, b1_ref, w2_ref, b2_ref, o_ref):
    # x:  [TILE_N, H]       w1: [H, H]        b1: [1, H]
    # w2: [H, H_out]        b2: [1, H_out]    o:  [TILE_N, H_out]
    h = jnp.dot(x_ref[...], w1_ref[...], preferred_element_type=jnp.float32)
    h = jnp.maximum(h + b1_ref[...], 0.0)
    o_ref[...] = (jnp.dot(h.astype(w2_ref.dtype), w2_ref[...],
                          preferred_element_type=jnp.float32)
                  + b2_ref[...]).astype(o_ref.dtype)


def causal_forward(causal, fused, *, min_rows_for_pallas=512):
    """Fused object_mlp forward. causal: [N, hidden] -> [N, hidden_out] f32."""
    n, hidden = causal.shape
    hidden_out = fused["b2"].shape[1]
    w_dtype = fused["w1"].dtype
    x = causal.astype(w_dtype) if causal.dtype != w_dtype else causal

    if n < min_rows_for_pallas:
        # Tiny-N fast path: XLA fused matmul beats fixed pallas_call overhead.
        h = jnp.maximum(x @ fused["w1"] + fused["b1"], 0.0)
        return (h.astype(w_dtype) @ fused["w2"] + fused["b2"]).astype(jnp.float32)

    # Row tiling: >=8 rows, <=4096 rows, and >=2 grid steps whenever n > 8 so
    # both v7x TensorCores get work (harmless on v5e/v6e single-TC).
    tile_n = min(4096, max(8, _round_up(-(-n // 2), 8)))
    grid = (pl.cdiv(n, tile_n),)

    return pl.pallas_call(
        causal_mlp_kernel,
        out_shape=jax.ShapeDtypeStruct((n, hidden_out), jnp.float32),
        grid=grid,
        in_specs=[
            pl.BlockSpec((tile_n, hidden), lambda i: (i, 0)),      # x rows
            pl.BlockSpec((hidden, hidden), lambda i: (0, 0)),      # W1 (resident)
            pl.BlockSpec((1, hidden), lambda i: (0, 0)),           # b1 (resident)
            pl.BlockSpec((hidden, hidden_out), lambda i: (0, 0)),  # W2 (resident)
            pl.BlockSpec((1, hidden_out), lambda i: (0, 0)),       # b2 (resident)
        ],
        out_specs=pl.BlockSpec((tile_n, hidden_out), lambda i: (i, 0)),
        compiler_params=pltpu.CompilerParams(
            dimension_semantics=("parallel",)),
    )(x, fused["w1"], fused["b1"], fused["w2"], fused["b2"])


def init_params(key, hidden, hidden_out):
    """Raw module parameters, matching Causal.__init__ init."""
    k1, k2, k3, k4 = jax.random.split(key, 4)
    lim1 = 1.0 / jnp.sqrt(hidden)
    return {
        # BatchNorm1d params per Causal.__init__: weight=1, bias=1e-4
        "bn1_gamma": jnp.ones((1, hidden), jnp.float32),
        "bn1_beta": jnp.full((1, hidden), 1e-4, jnp.float32),
        "bn2_gamma": jnp.ones((1, hidden), jnp.float32),
        "bn2_beta": jnp.full((1, hidden), 1e-4, jnp.float32),
        # Linear(hidden, hidden) — stored [in, out]
        "w1": jax.random.uniform(k1, (hidden, hidden), jnp.float32, -lim1, lim1),
        "b1": jax.random.uniform(k2, (1, hidden), jnp.float32, -lim1, lim1),
        # Linear(hidden, hidden_out) — stored [in, out]
        "w2": jax.random.uniform(k3, (hidden, hidden_out), jnp.float32, -lim1, lim1),
        "b2": jax.random.uniform(k4, (1, hidden_out), jnp.float32, -lim1, lim1),
    }


def fold_params(params, running_mean1=None, running_var1=None,
                running_mean2=None, running_var2=None, dtype=jnp.float32):
    """One-time param transform: fold eval-mode BatchNorm (explicit running
    stats; defaults = fresh init mean=0/var=1) into the two Linear layers.
    `dtype` optionally stores the weights in bf16 (biases stay f32)."""
    hidden = params["w1"].shape[0]

    def stats(mean, var):
        m = jnp.zeros((1, hidden), jnp.float32) if mean is None else jnp.reshape(mean, (1, hidden))
        v = jnp.ones((1, hidden), jnp.float32) if var is None else jnp.reshape(var, (1, hidden))
        return m, v

    rm1, rv1 = stats(running_mean1, running_var1)
    rm2, rv2 = stats(running_mean2, running_var2)

    # BN then Linear:  ((x - m)*s + beta) @ W + b
    #               == x @ (s^T * W) + ((beta - s*m) @ W + b)
    s1 = params["bn1_gamma"] / jnp.sqrt(rv1 + BN_EPS)                 # [1, H]
    t1 = params["bn1_beta"] - s1 * rm1                                # [1, H]
    w1f = s1.reshape(hidden, 1) * params["w1"]                        # [H, H]
    b1f = t1 @ params["w1"] + params["b1"]                            # [1, H]

    s2 = params["bn2_gamma"] / jnp.sqrt(rv2 + BN_EPS)
    t2 = params["bn2_beta"] - s2 * rm2
    w2f = s2.reshape(hidden, 1) * params["w2"]                        # [H, H_out]
    b2f = t2 @ params["w2"] + params["b2"]                            # [1, H_out]

    return {"w1": w1f.astype(dtype), "b1": b1f.astype(jnp.float32),
            "w2": w2f.astype(dtype), "b2": b2f.astype(jnp.float32)}


def reference_forward(causal, params):
    """Plain-JAX reference of the unfolded module math (eval-mode BN,
    fresh running stats)."""
    inv_std = 1.0 / jnp.sqrt(1.0 + BN_EPS)
    h = causal * (params["bn1_gamma"] * inv_std) + params["bn1_beta"]
    h = h @ params["w1"] + params["b1"]
    h = jnp.maximum(h, 0.0)
    h = h * (params["bn2_gamma"] * inv_std) + params["bn2_beta"]
    return h @ params["w2"] + params["b2"]


if __name__ == "__main__":
    HIDDEN, HIDDEN_OUT = 32, 8

    key = jax.random.PRNGKey(0)
    k_x1, k_x2, k_p = jax.random.split(key, 3)
    params = init_params(k_p, HIDDEN, HIDDEN_OUT)
    fused = fold_params(params)

    # Small, module-typical case (a handful of pooled graphs). Force the Pallas
    # kernel path (threshold 0) so the kernel itself is exercised.
    n_small = 8
    x_small = jax.random.normal(k_x1, (n_small, HIDDEN), jnp.float32)
    out_small = jax.block_until_ready(
        causal_forward(x_small, fused, min_rows_for_pallas=0))
    ref_small = reference_forward(x_small, params)
    assert out_small.shape == (n_small, HIDDEN_OUT)
    assert jnp.allclose(out_small, ref_small, atol=1e-4, rtol=1e-5), (
        f"max abs err {jnp.max(jnp.abs(out_small - ref_small))}")

    # Ragged multi-tile case: exercises the cdiv grid, masked last block and
    # the 2-step 'parallel' row axis.
    n_big = 1000
    x_big = jax.random.normal(k_x2, (n_big, HIDDEN), jnp.float32)
    out_big = jax.block_until_ready(causal_forward(x_big, fused))
    ref_big = reference_forward(x_big, params)
    assert out_big.shape == (n_big, HIDDEN_OUT)
    assert jnp.allclose(out_big, ref_big, atol=1e-4, rtol=1e-5), (
        f"max abs err {jnp.max(jnp.abs(out_big - ref_big))}")

    # Default small-N fast path (plain jnp) matches too.
    out_fast = jax.block_until_ready(causal_forward(x_small, fused))
    assert jnp.allclose(out_fast, ref_small, atol=1e-4, rtol=1e-5)

    print("KERNEL_OK")
</pallas_src>

<mosaic_0001>
module attributes {stable_mosaic.version = 11 : i64} {
  func.func @causal_mlp_kernel(%arg0: i32, %arg1: memref<8x32xf32, #tpu.memory_space<vmem>>, %arg2: memref<32x32xf32, #tpu.memory_space<vmem>>, %arg3: memref<1x32xf32, #tpu.memory_space<vmem>>, %arg4: memref<32x8xf32, #tpu.memory_space<vmem>>, %arg5: memref<1x8xf32, #tpu.memory_space<vmem>>, %arg6: memref<8x8xf32, #tpu.memory_space<vmem>>) attributes {dimension_semantics = [#tpu.dimension_semantics<parallel>], iteration_bounds = array<i64: 1>, scalar_prefetch = 0 : i64, scratch_operands = 0 : i64, tpu.core_type = #tpu.core_type<tc>, window_params = [{transform_indices = @transform_0, window_bounds = array<i64: 8, 32>}, {pipeline_mode = #tpu.pipeline_mode<synchronous>, transform_indices = @transform_1, window_bounds = array<i64: 32, 32>}, {pipeline_mode = #tpu.pipeline_mode<synchronous>, transform_indices = @transform_2, window_bounds = array<i64: 1, 32>}, {pipeline_mode = #tpu.pipeline_mode<synchronous>, transform_indices = @transform_3, window_bounds = array<i64: 32, 8>}, {pipeline_mode = #tpu.pipeline_mode<synchronous>, transform_indices = @transform_4, window_bounds = array<i64: 1, 8>}, {transform_indices = @transform_5, window_bounds = array<i64: 8, 8>}]} {
    %c0 = arith.constant 0 : index
    %c0_0 = arith.constant 0 : index
    %0 = vector.load %arg1[%c0, %c0_0] : memref<8x32xf32, #tpu.memory_space<vmem>>, vector<8x32xf32>
    %c0_1 = arith.constant 0 : index
    %c0_2 = arith.constant 0 : index
    %1 = vector.load %arg2[%c0_1, %c0_2] : memref<32x32xf32, #tpu.memory_space<vmem>>, vector<32x32xf32>
    %cst = arith.constant dense<0.000000e+00> : vector<8x32xf32>
    %2 = tpu.matmul %0, %1, %cst {dimension_numbers = #tpu.dot_dimension_numbers<[1], [0], [0], [1], [0, 0, 1, 1], [], []>} : vector<8x32xf32>, vector<32x32xf32>, vector<8x32xf32> -> vector<8x32xf32>
    %c0_3 = arith.constant 0 : index
    %c0_4 = arith.constant 0 : index
    %3 = vector.load %arg3[%c0_3, %c0_4] : memref<1x32xf32, #tpu.memory_space<vmem>>, vector<1x32xf32>
    %4 = vector.broadcast %3 : vector<1x32xf32> to vector<8x32xf32>
    %5 = arith.addf %2, %4 : vector<8x32xf32>
    %cst_5 = arith.constant 0.000000e+00 : f32
    %6 = vector.broadcast %cst_5 : f32 to vector<8x32xf32>
    %7 = arith.maximumf %5, %6 : vector<8x32xf32>
    %c0_6 = arith.constant 0 : index
    %c0_7 = arith.constant 0 : index
    %8 = vector.load %arg4[%c0_6, %c0_7] : memref<32x8xf32, #tpu.memory_space<vmem>>, vector<32x8xf32>
    %cst_8 = arith.constant dense<0.000000e+00> : vector<8x8xf32>
    %9 = tpu.matmul %7, %8, %cst_8 {dimension_numbers = #tpu.dot_dimension_numbers<[1], [0], [0], [1], [0, 0, 1, 1], [], []>} : vector<8x32xf32>, vector<32x8xf32>, vector<8x8xf32> -> vector<8x8xf32>
    %c0_9 = arith.constant 0 : index
    %c0_10 = arith.constant 0 : index
    %10 = vector.load %arg5[%c0_9, %c0_10] : memref<1x8xf32, #tpu.memory_space<vmem>>, vector<1x8xf32>
    %11 = vector.broadcast %10 : vector<1x8xf32> to vector<8x8xf32>
    %12 = arith.addf %9, %11 : vector<8x8xf32>
    %c0_11 = arith.constant 0 : index
    %c0_12 = arith.constant 0 : index
    %13 = vector.load %arg6[%c0_11, %c0_12] : memref<8x8xf32, #tpu.memory_space<vmem>>, vector<8x8xf32>
    tpu.vector_store %arg6[%c0_11, %c0_12], %12 {strides = array<i32>} : memref<8x8xf32, #tpu.memory_space<vmem>>, vector<8x8xf32>,
    return
  }
  func.func @transform_0(%arg0: i32) -> (i32, i32) {
    %c0_i32 = arith.constant 0 : i32
    %c0_i32_0 = arith.constant 0 : i32
    return %arg0, %c0_i32 : i32, i32
  }
  func.func @transform_1(%arg0: i32) -> (i32, i32) {
    %c0_i32 = arith.constant 0 : i32
    %c0_i32_0 = arith.constant 0 : i32
    %c0_i32_1 = arith.constant 0 : i32
    return %c0_i32, %c0_i32_0 : i32, i32
  }
  func.func @transform_2(%arg0: i32) -> (i32, i32) {
    %c0_i32 = arith.constant 0 : i32
    %c0_i32_0 = arith.constant 0 : i32
    %c0_i32_1 = arith.constant 0 : i32
    return %c0_i32, %c0_i32_0 : i32, i32
  }
  func.func @transform_3(%arg0: i32) -> (i32, i32) {
    %c0_i32 = arith.constant 0 : i32
    %c0_i32_0 = arith.constant 0 : i32
    %c0_i32_1 = arith.constant 0 : i32
    return %c0_i32, %c0_i32_0 : i32, i32
  }
  func.func @transform_4(%arg0: i32) -> (i32, i32) {
    %c0_i32 = arith.constant 0 : i32
    %c0_i32_0 = arith.constant 0 : i32
    %c0_i32_1 = arith.constant 0 : i32
    return %c0_i32, %c0_i32_0 : i32, i32
  }
  func.func @transform_5(%arg0: i32) -> (i32, i32) {
    %c0_i32 = arith.constant 0 : i32
    %c0_i32_0 = arith.constant 0 : i32
    return %arg0, %c0_i32 : i32, i32
  }
}

</mosaic_0001>

<bundles_post_ra>
// kernel: tpu_custom_call.1
= control target key start
LH: loop header
LB: loop body
LE: loop exit
PB: predicated region body
PF: predicated region fallthrough
CT: control target
= control target key end

     0   :  { %v284_v3 = vmov 0.0|0.0   ;;  %vm285_vm0 = vmmov 0   ;;  %v286_v6 = vmov 0.0   ;;  %s363_s0 = inlined_call_operand.vmem [shape: f32[8,32], index: 0, kind: input, shape index: {}]   ;;  %s364_s1 = inlined_call_operand.vmem [shape: f32[32,32], index: 1, kind: input, shape index: {}]   ;;  %s365_s2 = inlined_call_operand.vmem [shape: f32[1,32], index: 2, kind: input, shape index: {}]   ;;  %s366_s3 = inlined_call_operand.vmem [shape: f32[32,8], index: 3, kind: input, shape index: {}]   ;;  %s367_s4 = inlined_call_operand.vmem [shape: f32[1,8], index: 4, kind: input, shape index: {}]   ;;  %s368_s5 = inlined_call_operand.hbm [shape: f32[8,8], index: 5, kind: output, shape index: {}]  }
   0x1   :  { %v22_v0 = vld [vmem:[%s364_s1] sm:$0xff]  ;;  %v23_v1 = vld [vmem:[%s364_s1 + $0x8] sm:$0xff]  ;;  %v24_v2 = vld [vmem:[%s364_s1 + $0x10] sm:$0xff]  ;;  %244 = vmatprep.subr.bf16.mxu0 %v284_v3  ;;  %230 = vmatprep.mubr.msk.f32.mxu0 %vm285_vm0, %v286_v6 }
   0x2   :  { %v245_v4 = vpack.c.bf16 %v23_v1, %v22_v0  ;;  %v25_v5 = vld [vmem:[%s364_s1 + $0x18] sm:$0xff]  ;;  %v108_v7 = vld [vmem:[%s366_s3] sm:$0xff]  ;;  %250 = vmatprep.subr.bf16.mxu1 %v284_v3  ;;  %v109_v8 = vld [vmem:[%s366_s3 + $0x8] sm:$0xff]  ;;  %241 = vmatprep.mubr.msk.f32.mxu1 %vm285_vm0, %v286_v6 }
   0x3   :  { %10 = vsyncpa [#allocation3], 0  ;;  %v248_v9 = vpack.c.bf16 %v25_v5, %v24_v2  ;;  %v251_v10 = vpack.c.bf16 %v109_v8, %v108_v7  ;;  %v21_v11 = vld [vmem:[%s363_s0] sm:$0xff]  ;;  %vm33_vm1 = vcmask 261120   ;;  %v110_v12 = vld [vmem:[%s366_s3 + $0x10] sm:$0xff]  ;;  %s287_s13 = smov [#allocation2]  }
   0x4   :  { %246 = vmatpush3.bf16.msra.mxu0 %v245_v4  ;;  %v111_v13 = vld [vmem:[%s366_s3 + $0x18] sm:$0xff]  ;;  %v208_v15 = vld [vmem:[%s365_s2] ss:$0 sm:$0xff]  ;;  %s200_s14 = sshll.u32 %s287_s13, 4  ;;  %vm192_vm2 = vcmask 64512   ;;  %s201_s14 = int_to_ptr.vmem [resolvable:$true] %s200_s14 }
   0x5   :  { %247 = vmatprep.subr.bf16.mxu0 %v284_v3  ;;  %252 = vmatpush3.bf16.msra.mxu1 %v251_v10  ;;  %v254_v14 = vpack.c.bf16 %v111_v13, %v110_v12  ;;  %v210_v20 = vld [vmem:[%s367_s4] ss:$0 sm:$0xff]  ;;  %s260_s3 = scalar_lea.vmem %s201_s14, 128  ;;  %p265_p1 = scmp.lt.s32.totalorder %s201_s14, %s201_s14 }
   0x6   :  { %253 = vmatprep.subr.bf16.mxu1 %v284_v3  ;;  %p261_p0 = scmp.ne.s32.totalorder %s201_s14, %s260_s3  ;;  %p266_p2 = scmp.lt.s32.totalorder %s260_s3, %s260_s3 }
   0x8   :  { %249 = vmatpush3.bf16.msra.mxu0 %v248_v9  ;;  %p267_p3 = por %p266_p2, %p265_p1 }
   0x9   :  { %255 = vmatpush3.bf16.msra.mxu1 %v254_v14 }
   0xa   :  { %p268_p4 = pnand %p267_p3, %p261_p0 }
   0xb   :  { %231 = vmatmul.mubr.msk.f32.vlgmr.msra.gmra.mrb[0].mxu0 %vm33_vm1, %v21_v11 }
  0xde   :  { %v103_v16 = vpop.f32.mrb[0].mxu0 }
  0xdf   :  { %v104_v17 = vadd.f32 %v208_v15, %v103_v16  ;;  %v232_v18 = vpop.f32.mrb[1].mxu0 }
  0xe1   :  { %v107_v19 = vmax.f32 %v104_v17, 0.0 }
  0xe3   :  { %242 = vmatmul.mubr.msk.f32.vlgmr.msra.gmra.mrb[0].mxu1 %vm33_vm1, %v107_v19 }
 0x1b6   :  { %v188_v21 = vpop.f32.mrb[0].mxu1 }
 0x1b7   :  { %v189_v22 = vadd.f32 %v210_v20, %v188_v21  ;;  %v243_v23 = vpop.f32.mrb[1].mxu1 }
 0x1b9   :  { %193 = vst.msk [vmem:[#allocation2] sm:$0xff] %vm192_vm2, %v189_v22 }
 0x1ba   :  { %271 = shalt.err (!%p268_p4)
}
 0x1bb   :  { %s272_s16 = scalar_lea.hbm %s368_s5, 128 }
 0x1bc   :  { %p273_p5 = scmp.ne.s32.totalorder %s368_s5, %s272_s16  ;;  %p276_p6 = scmp.lt.u32.totalorder %s272_s16, %s368_s5 }
 0x1be   :  { %p278_p7 = pnand %p276_p6, %p273_p5 }
 0x1c0   :  { %281 = shalt.err (!%p278_p7)
}
 0x1c1   :  { %203 = dma.vmem_to_hbm [thread:$0]  %s201_s14, 128, %s368_s5, [#allocation3]  }
 0x1c2   :  { %282 = dma.done.wait [#allocation3], 128  }
 0x1c3   :  { %283 = vsyncadd [#allocation3], 4294967168 }
 0x1c4   :  { %207 = vsyncpa [#allocation3], 1 }

</bundles_post_ra>
